<compile_context>
chip_gen: v7x
topology: tpu7x:2x2x1
jax: 0.10.0
libtpu: 0.0.40
codegen_flags: <defaults>
</compile_context>

<pallas_src>
import functools
import math

import numpy as np

import jax
import jax.numpy as jnp
from jax import lax
from jax.experimental import pallas as pl
from jax.experimental.pallas import tpu as pltpu


def _round_up(v, m):
    return ((v + m - 1) // m) * m


def _cdiv(a, b):
    return (a + b - 1) // b


# Memory-space enum (robust across minor jax version differences).
_MS = getattr(pltpu, "MemorySpace", None) or getattr(pltpu, "TPUMemorySpace", None)
_VMEM_SPACE = getattr(_MS, "VMEM", None) if _MS is not None else None


def _resident_spec(shape):
    """Whole-array, VMEM-resident input: DMA'd once, single-buffered."""
    if _VMEM_SPACE is not None:
        return pl.BlockSpec(memory_space=_VMEM_SPACE)
    # Fallback: blocked whole-array spec (correct, merely double-buffered).
    return pl.BlockSpec(shape, lambda i: (0,) * len(shape))


def _mlp_kernel(x_ref, *refs):
    """Whole-MLP forward for one batch tile; weights/biases are VMEM-resident.

    refs = (w0, b0, w1, b1, ..., w_{L-1}, b_{L-1}, out_ref, xpad_ref)
    Weights arrive already in the compute dtype; accumulation is always f32.
    """
    *param_refs, out_ref, xpad_ref = refs
    n_layers = len(param_refs) // 2
    in_dim = x_ref.shape[-1]
    in_p = xpad_ref.shape[-1]
    out_dim = out_ref.shape[-1]
    compute_dtype = param_refs[0].dtype

    if in_dim < in_p:
        # Zero-pad the input tile to a lane-aligned width inside VMEM (cheap; keeps
        # every matmul 128-aligned). Re-zero every step: the scratch is per-core
        # under megacore sharding, so a program_id(0)==0 init would be unsafe.
        xpad_ref[...] = jnp.zeros_like(xpad_ref)
        xpad_ref[:, :in_dim] = x_ref[...].astype(jnp.float32)
        h = xpad_ref[...]
    else:
        h = x_ref[...].astype(jnp.float32)

    for i in range(n_layers):
        w = param_refs[2 * i][...]                           # (d_in_p, d_out_p)
        b = param_refs[2 * i + 1][...].astype(jnp.float32)   # (1, d_out_p), f32
        h = jnp.dot(h.astype(compute_dtype), w,
                    preferred_element_type=jnp.float32) + b
        if i < n_layers - 1:
            h = jnp.tanh(h)                                  # EUP slot

    if out_dim < h.shape[-1]:
        h = h[:, :out_dim]            # drop padded lanes; store only true output
    out_ref[...] = h.astype(out_ref.dtype)


@functools.partial(jax.jit,
                   static_argnames=("batch_tile", "compute_dtype", "lane_align"))
def mlp_forward(x, params, *, batch_tile=512, compute_dtype=jnp.float32,
                lane_align=128):
    """MLP forward with a single fused, weights-resident Pallas kernel.

    x:      (batch, input_dim)
    params: list of (W, b); W shape (in, out) (= PyTorch weight transposed),
            b shape (out,).
    lane_align: 128 everywhere; compute-bound wide nets (width >= 512) may use
            256 on v6e/v7x to fill the 2x256^2 MXU.
    """
    batch, in_dim = x.shape
    n_layers = len(params)
    out_dim = params[-1][0].shape[1]

    dims = [in_dim] + [w.shape[1] for (w, _) in params]
    dims_p = [_round_up(d, lane_align) for d in dims]

    # --- Balanced batch tiling; >=2 tiles when possible (v7x megacore). --------
    n_tiles = max(1, _cdiv(batch, batch_tile))
    if batch >= 16 and n_tiles < 2:
        n_tiles = 2
    bt = _round_up(_cdiv(batch, n_tiles), 8)      # sublane multiple
    grid = (_cdiv(batch, bt),)                    # tail block is masked by Pallas

    # --- Hardware-aware VMEM budgeting (v5e/v6e: 128 MiB, v7x: 64 MiB/TC). -----
    try:
        vmem_cap = int(pltpu.get_tpu_info().vmem_capacity_bytes)
    except Exception:
        vmem_cap = 64 << 20                       # conservative (v7x per-core)

    if np.dtype(compute_dtype) == np.dtype(np.float32):
        f32_param_bytes = sum(dims_p[l] * dims_p[l + 1] * 4 + dims_p[l + 1] * 4
                              for l in range(n_layers))
        if f32_param_bytes > vmem_cap // 2:
            # Weights would not fit resident in f32: fall back to bf16 weights
            # (MXU-native on v5e/v6e/v7x); accumulation stays f32.
            compute_dtype = jnp.bfloat16
    # TODO(synk): if even bf16 weights exceed VMEM (very wide/deep nets), add an
    # output-width (N) tiling grid axis instead of whole-weights residency.

    cbytes = np.dtype(compute_dtype).itemsize

    # --- Pad weights/biases wrapper-side (zeros are exact; see header). --------
    flat_args = []
    in_specs = [pl.BlockSpec((bt, in_dim), lambda i: (i, 0))]   # x: true width
    for li, (w, b) in enumerate(params):
        d_in_p, d_out_p = dims_p[li], dims_p[li + 1]
        w_p = jnp.pad(w, ((0, d_in_p - w.shape[0]),
                          (0, d_out_p - w.shape[1]))).astype(compute_dtype)
        b_p = jnp.pad(b, (0, d_out_p - b.shape[0])).reshape(1, -1)   # stays f32
        flat_args += [w_p, b_p]
        in_specs += [_resident_spec((d_in_p, d_out_p)),
                     _resident_spec((1, d_out_p))]

    out_spec = pl.BlockSpec((bt, out_dim), lambda i: (i, 0))    # out: true width

    # --- VMEM budget: 1x resident params + double-buffered I/O tiles + acts. ---
    param_bytes = sum(dims_p[l] * dims_p[l + 1] * cbytes + dims_p[l + 1] * 4
                      for l in range(n_layers))
    io_bytes = 2 * bt * (_round_up(in_dim, 128) + _round_up(out_dim, 128)) \
        * np.dtype(x.dtype).itemsize
    act_bytes = 4 * bt * max(dims_p) * 4 + bt * dims_p[0] * 4
    vmem_needed = param_bytes + io_bytes + act_bytes
    vmem_limit = int(min(max(vmem_needed + (4 << 20), 32 << 20),
                         vmem_cap - (4 << 20)))

    return pl.pallas_call(
        _mlp_kernel,
        out_shape=jax.ShapeDtypeStruct((batch, out_dim), x.dtype),
        grid_spec=pltpu.PrefetchScalarGridSpec(
            num_scalar_prefetch=0,
            grid=grid,
            in_specs=in_specs,
            out_specs=out_spec,
            scratch_shapes=[pltpu.VMEM((bt, dims_p[0]), jnp.float32)],
        ),
        compiler_params=pltpu.CompilerParams(
            dimension_semantics=("parallel",),
            vmem_limit_bytes=vmem_limit,
        ),
    )(x, *flat_args)


def init_params(key, input_dim, output_dim, width, hidden_layers):
    """Mirrors torch.nn.Linear default init U(-1/sqrt(in), 1/sqrt(in)).

    Weights stored as (in_features, out_features) = PyTorch weight transposed.
    """
    dims = [input_dim] + [width] * (hidden_layers + 1) + [output_dim]
    params = []
    for d_in, d_out in zip(dims[:-1], dims[1:]):
        key, kw, kb = jax.random.split(key, 3)
        bound = 1.0 / math.sqrt(d_in)
        w = jax.random.uniform(kw, (d_in, d_out), jnp.float32, -bound, bound)
        b = jax.random.uniform(kb, (d_out,), jnp.float32, -bound, bound)
        params.append((w, b))
    return params


def mlp_reference(x, params, compute_dtype=jnp.float32):
    """Pure-JAX reference (HIGHEST precision matmuls, f32 accumulation)."""
    h = x.astype(jnp.float32)
    for i, (w, b) in enumerate(params):
        h = jnp.dot(h.astype(compute_dtype), w.astype(compute_dtype),
                    preferred_element_type=jnp.float32,
                    precision=lax.Precision.HIGHEST) + b
        if i < len(params) - 1:
            h = jnp.tanh(h)
    return h.astype(x.dtype)


if __name__ == "__main__":
    # Shapes consistent with Net(input_dim=4, output_dim=3, width=32, hidden_layers=1).
    input_dim, output_dim, width, hidden_layers = 4, 3, 32, 1

    key = jax.random.PRNGKey(0)
    key, kx = jax.random.split(key)
    params = init_params(key, input_dim, output_dim, width, hidden_layers)

    # Small batch: single grid step, no HBM padding anywhere.
    batch = 8
    x = jax.random.normal(kx, (batch, input_dim), dtype=jnp.float32)
    out = jax.block_until_ready(mlp_forward(x, params))
    ref = mlp_reference(x, params)
    assert out.shape == (batch, output_dim)
    assert jnp.allclose(out, ref, atol=1e-4, rtol=1e-4), "f32 small-batch mismatch"

    # Non-divisible batch: balanced multi-tile parallel grid with a masked tail tile.
    key, kx2 = jax.random.split(key)
    batch2 = 300
    x2 = jax.random.normal(kx2, (batch2, input_dim), dtype=jnp.float32)
    out2 = jax.block_until_ready(mlp_forward(x2, params, batch_tile=128))
    ref2 = mlp_reference(x2, params)
    assert out2.shape == (batch2, output_dim)
    assert jnp.allclose(out2, ref2, atol=1e-4, rtol=1e-4), "f32 tiled-batch mismatch"

    # bf16-weight MXU path, checked against a matching bf16-weight reference
    # (both accumulate in f32), with a much tighter tolerance than before.
    out_bf = jax.block_until_ready(
        mlp_forward(x2, params, compute_dtype=jnp.bfloat16))
    ref_bf = mlp_reference(x2, params, compute_dtype=jnp.bfloat16)
    assert jnp.allclose(out_bf, ref_bf, atol=2e-2, rtol=2e-2), "bf16 path mismatch"

    # TODO(synk): Net.grad (autograd d/dx) is not part of forward(); obtain it via
    # jax.grad / jax.jacobian over mlp_forward rather than a dedicated backward kernel.
    print("KERNEL_OK")
</pallas_src>

<mosaic_0001>
module attributes {stable_mosaic.version = 11 : i64} {
  func.func @_mlp_kernel(%arg0: i32, %arg1: memref<8x4xf32, #tpu.memory_space<vmem>>, %arg2: memref<128x128xf32, #tpu.memory_space<vmem>>, %arg3: memref<1x128xf32, #tpu.memory_space<vmem>>, %arg4: memref<128x128xf32, #tpu.memory_space<vmem>>, %arg5: memref<1x128xf32, #tpu.memory_space<vmem>>, %arg6: memref<128x128xf32, #tpu.memory_space<vmem>>, %arg7: memref<1x128xf32, #tpu.memory_space<vmem>>, %arg8: memref<8x3xf32, #tpu.memory_space<vmem>>, %arg9: memref<8x128xf32, #tpu.memory_space<vmem>>) attributes {dimension_semantics = [#tpu.dimension_semantics<parallel>], iteration_bounds = array<i64: 1>, scalar_prefetch = 0 : i64, scratch_operands = 1 : i64, tpu.core_type = #tpu.core_type<tc>, window_params = [{transform_indices = @transform_0, window_bounds = array<i64: 8, 4>}, {pipeline_mode = #tpu.pipeline_mode<synchronous>, transform_indices = @transform_1, window_bounds = array<i64: 128, 128>}, {pipeline_mode = #tpu.pipeline_mode<synchronous>, transform_indices = @transform_2, window_bounds = array<i64: 1, 128>}, {pipeline_mode = #tpu.pipeline_mode<synchronous>, transform_indices = @transform_3, window_bounds = array<i64: 128, 128>}, {pipeline_mode = #tpu.pipeline_mode<synchronous>, transform_indices = @transform_4, window_bounds = array<i64: 1, 128>}, {pipeline_mode = #tpu.pipeline_mode<synchronous>, transform_indices = @transform_5, window_bounds = array<i64: 128, 128>}, {pipeline_mode = #tpu.pipeline_mode<synchronous>, transform_indices = @transform_6, window_bounds = array<i64: 1, 128>}, {transform_indices = @transform_7, window_bounds = array<i64: 8, 3>}]} {
    %cst = arith.constant 0.000000e+00 : f32
    %0 = vector.broadcast %cst : f32 to vector<8x128xf32>
    %c0 = arith.constant 0 : index
    %c0_0 = arith.constant 0 : index
    %1 = vector.load %arg9[%c0, %c0_0] : memref<8x128xf32, #tpu.memory_space<vmem>>, vector<8x128xf32>
    tpu.vector_store %arg9[%c0, %c0_0], %0 {strides = array<i32>} : memref<8x128xf32, #tpu.memory_space<vmem>>, vector<8x128xf32>,
    %c0_1 = arith.constant 0 : index
    %c0_2 = arith.constant 0 : index
    %2 = vector.load %arg1[%c0_1, %c0_2] : memref<8x4xf32, #tpu.memory_space<vmem>>, vector<8x4xf32>
    %c0_3 = arith.constant 0 : index
    %c0_4 = arith.constant 0 : index
    %3 = vector.load %arg9[%c0_3, %c0_4] : memref<8x128xf32, #tpu.memory_space<vmem>>, vector<8x4xf32>
    tpu.vector_store %arg9[%c0_3, %c0_4], %2 {strides = array<i32>} : memref<8x128xf32, #tpu.memory_space<vmem>>, vector<8x4xf32>,
    %c0_5 = arith.constant 0 : index
    %c0_6 = arith.constant 0 : index
    %4 = vector.load %arg9[%c0_5, %c0_6] : memref<8x128xf32, #tpu.memory_space<vmem>>, vector<8x128xf32>
    %c0_7 = arith.constant 0 : index
    %c0_8 = arith.constant 0 : index
    %5 = vector.load %arg2[%c0_7, %c0_8] : memref<128x128xf32, #tpu.memory_space<vmem>>, vector<128x128xf32>
    %c0_9 = arith.constant 0 : index
    %c0_10 = arith.constant 0 : index
    %6 = vector.load %arg3[%c0_9, %c0_10] : memref<1x128xf32, #tpu.memory_space<vmem>>, vector<1x128xf32>
    %cst_11 = arith.constant dense<0.000000e+00> : vector<8x128xf32>
    %7 = tpu.matmul %4, %5, %cst_11 {dimension_numbers = #tpu.dot_dimension_numbers<[1], [0], [0], [1], [0, 0, 1, 1], [], []>} : vector<8x128xf32>, vector<128x128xf32>, vector<8x128xf32> -> vector<8x128xf32>
    %8 = vector.broadcast %6 : vector<1x128xf32> to vector<8x128xf32>
    %9 = arith.addf %7, %8 : vector<8x128xf32>
    %10 = math.tanh %9 : vector<8x128xf32>
    %c0_12 = arith.constant 0 : index
    %c0_13 = arith.constant 0 : index
    %11 = vector.load %arg4[%c0_12, %c0_13] : memref<128x128xf32, #tpu.memory_space<vmem>>, vector<128x128xf32>
    %c0_14 = arith.constant 0 : index
    %c0_15 = arith.constant 0 : index
    %12 = vector.load %arg5[%c0_14, %c0_15] : memref<1x128xf32, #tpu.memory_space<vmem>>, vector<1x128xf32>
    %cst_16 = arith.constant dense<0.000000e+00> : vector<8x128xf32>
    %13 = tpu.matmul %10, %11, %cst_16 {dimension_numbers = #tpu.dot_dimension_numbers<[1], [0], [0], [1], [0, 0, 1, 1], [], []>} : vector<8x128xf32>, vector<128x128xf32>, vector<8x128xf32> -> vector<8x128xf32>
    %14 = vector.broadcast %12 : vector<1x128xf32> to vector<8x128xf32>
    %15 = arith.addf %13, %14 : vector<8x128xf32>
    %16 = math.tanh %15 : vector<8x128xf32>
    %c0_17 = arith.constant 0 : index
    %c0_18 = arith.constant 0 : index
    %17 = vector.load %arg6[%c0_17, %c0_18] : memref<128x128xf32, #tpu.memory_space<vmem>>, vector<128x128xf32>
    %c0_19 = arith.constant 0 : index
    %c0_20 = arith.constant 0 : index
    %18 = vector.load %arg7[%c0_19, %c0_20] : memref<1x128xf32, #tpu.memory_space<vmem>>, vector<1x128xf32>
    %cst_21 = arith.constant dense<0.000000e+00> : vector<8x128xf32>
    %19 = tpu.matmul %16, %17, %cst_21 {dimension_numbers = #tpu.dot_dimension_numbers<[1], [0], [0], [1], [0, 0, 1, 1], [], []>} : vector<8x128xf32>, vector<128x128xf32>, vector<8x128xf32> -> vector<8x128xf32>
    %20 = vector.broadcast %18 : vector<1x128xf32> to vector<8x128xf32>
    %21 = arith.addf %19, %20 : vector<8x128xf32>
    %22 = vector.extract_strided_slice %21 {offsets = [0, 0], sizes = [8, 3], strides = [1, 1]} : vector<8x128xf32> to vector<8x3xf32>
    %c0_22 = arith.constant 0 : index
    %c0_23 = arith.constant 0 : index
    %23 = vector.load %arg8[%c0_22, %c0_23] : memref<8x3xf32, #tpu.memory_space<vmem>>, vector<8x3xf32>
    tpu.vector_store %arg8[%c0_22, %c0_23], %22 {strides = array<i32>} : memref<8x3xf32, #tpu.memory_space<vmem>>, vector<8x3xf32>,
    return
  }
  func.func @transform_0(%arg0: i32) -> (i32, i32) {
    %c0_i32 = arith.constant 0 : i32
    %c0_i32_0 = arith.constant 0 : i32
    return %arg0, %c0_i32 : i32, i32
  }
  func.func @transform_1(%arg0: i32) -> (i32, i32) {
    %c0_i32 = arith.constant 0 : i32
    %c0_i32_0 = arith.constant 0 : i32
    %c0_i32_1 = arith.constant 0 : i32
    return %c0_i32, %c0_i32_0 : i32, i32
  }
  func.func @transform_2(%arg0: i32) -> (i32, i32) {
    %c0_i32 = arith.constant 0 : i32
    %c0_i32_0 = arith.constant 0 : i32
    %c0_i32_1 = arith.constant 0 : i32
    return %c0_i32, %c0_i32_0 : i32, i32
  }
  func.func @transform_3(%arg0: i32) -> (i32, i32) {
    %c0_i32 = arith.constant 0 : i32
    %c0_i32_0 = arith.constant 0 : i32
    %c0_i32_1 = arith.constant 0 : i32
    return %c0_i32, %c0_i32_0 : i32, i32
  }
  func.func @transform_4(%arg0: i32) -> (i32, i32) {
    %c0_i32 = arith.constant 0 : i32
    %c0_i32_0 = arith.constant 0 : i32
    %c0_i32_1 = arith.constant 0 : i32
    return %c0_i32, %c0_i32_0 : i32, i32
  }
  func.func @transform_5(%arg0: i32) -> (i32, i32) {
    %c0_i32 = arith.constant 0 : i32
    %c0_i32_0 = arith.constant 0 : i32
    %c0_i32_1 = arith.constant 0 : i32
    return %c0_i32, %c0_i32_0 : i32, i32
  }
  func.func @transform_6(%arg0: i32) -> (i32, i32) {
    %c0_i32 = arith.constant 0 : i32
    %c0_i32_0 = arith.constant 0 : i32
    %c0_i32_1 = arith.constant 0 : i32
    return %c0_i32, %c0_i32_0 : i32, i32
  }
  func.func @transform_7(%arg0: i32) -> (i32, i32) {
    %c0_i32 = arith.constant 0 : i32
    %c0_i32_0 = arith.constant 0 : i32
    return %arg0, %c0_i32 : i32, i32
  }
}

</mosaic_0001>

<bundles_post_ra>
// kernel: mlp_forward.1
= control target key start
LH: loop header
LB: loop body
LE: loop exit
PB: predicated region body
PF: predicated region fallthrough
CT: control target
= control target key end

     0   :  { %v556_v0 = vmov 0.0|0.0   ;;  %v557_v4 = vmov 0.0   ;;  %vm558_vm0 = vmmov 0   ;;  %vm28_vm1 = vcmask 31744   ;;  %s789_s1 = inlined_call_operand.vmem [shape: f32[128,128], index: 1, kind: input, shape index: {}]   ;;  %s790_s0 = inlined_call_operand.vmem [shape: f32[8,4], index: 0, kind: input, shape index: {}]   ;;  %s791_s3 = inlined_call_operand.vmem [shape: f32[128,128], index: 3, kind: input, shape index: {}]   ;;  %s792_s5 = inlined_call_operand.vmem [shape: f32[128,128], index: 5, kind: input, shape index: {}]   ;;  %s793_s2 = inlined_call_operand.vmem [shape: f32[1,128], index: 2, kind: input, shape index: {}]   ;;  %s794_s4 = inlined_call_operand.vmem [shape: f32[1,128], index: 4, kind: input, shape index: {}]   ;;  %s795_s6 = inlined_call_operand.vmem [shape: f32[1,128], index: 6, kind: input, shape index: {}]   ;;  %s796_s7 = inlined_call_operand.vmem [shape: f32[8,3], index: 7, kind: output, shape index: {}]  }
   0x1   :  { %477 = vmatprep.subr.bf16.mxu0 %v556_v0  ;;  %v31_v1 = vld [vmem:[%s789_s1] sm:$0xff]  ;;  %v32_v2 = vld [vmem:[%s789_s1 + $0x8] sm:$0xff]  ;;  %v33_v3 = vld [vmem:[%s789_s1 + $0x10] sm:$0xff]  ;;  %26 = vst [vmem:[#allocation2] sm:$0xff] %v557_v4  ;;  %404 = vmatprep.mubr.msk.f32.mxu0 %vm558_vm0, %v557_v4  ;;  %vm312_vm2 = vcmask 23552  }
   0x2   :  { %v478_v5 = vpack.c.bf16 %v32_v2, %v31_v1  ;;  %v34_v6 = vld [vmem:[%s789_s1 + $0x18] sm:$0xff]  ;;  %501 = vmatprep.subr.bf16.mxu1 %v556_v0  ;;  %439 = vmatprep.mubr.msk.f32.mxu1 %vm558_vm0, %v557_v4  ;;  %v35_v8 = vld [vmem:[%s789_s1 + $0x20] sm:$0xff]  ;;  %v36_v9 = vld [vmem:[%s789_s1 + $0x28] sm:$0xff] }
   0x3   :  { %v481_v7 = vpack.c.bf16 %v34_v6, %v33_v3  ;;  %v27_v10 = vld [vmem:[%s790_s0] sm:$0xff]  ;;  %v126_v12 = vld [vmem:[%s791_s3 + $0x8] sm:$0xff]  ;;  %v127_v13 = vld [vmem:[%s791_s3 + $0x10] sm:$0xff]  ;;  %v484_v15 = vpack.c.bf16 %v36_v9, %v35_v8 }
   0x4   :  { %479 = vmatpush3.bf16.msra.mxu0 %v478_v5  ;;  %v125_v11 = vld [vmem:[%s791_s3] sm:$0xff]  ;;  %29 = vst.msk [vmem:[#allocation2] sm:$0xff] %vm28_vm1, %v27_v10  ;;  %v128_v14 = vld [vmem:[%s791_s3 + $0x18] sm:$0xff]  ;;  %v37_v17 = vld [vmem:[%s789_s1 + $0x30] sm:$0xff] }
   0x5   :  { %480 = vmatprep.subr.bf16.mxu0 %v556_v0  ;;  %v502_v16 = vpack.c.bf16 %v126_v12, %v125_v11  ;;  %v38_v18 = vld [vmem:[%s789_s1 + $0x38] sm:$0xff]  ;;  %v505_v19 = vpack.c.bf16 %v128_v14, %v127_v13  ;;  %v129_v20 = vld [vmem:[%s791_s3 + $0x20] sm:$0xff]  ;;  %v130_v21 = vld [vmem:[%s791_s3 + $0x28] sm:$0xff] }
   0x6   :  { %v487_v22 = vpack.c.bf16 %v38_v18, %v37_v17  ;;  %v39_v23 = vld [vmem:[%s789_s1 + $0x40] sm:$0xff]  ;;  %v40_v24 = vld [vmem:[%s789_s1 + $0x48] sm:$0xff]  ;;  %v508_v25 = vpack.c.bf16 %v130_v21, %v129_v20  ;;  %v131_v26 = vld [vmem:[%s791_s3 + $0x30] sm:$0xff] }
   0x7   :  { %503 = vmatpush3.bf16.msra.mxu1 %v502_v16  ;;  %v132_v27 = vld [vmem:[%s791_s3 + $0x38] sm:$0xff]  ;;  %v490_v28 = vpack.c.bf16 %v40_v24, %v39_v23  ;;  %v41_v29 = vld [vmem:[%s789_s1 + $0x50] sm:$0xff]  ;;  %v133_v32 = vld [vmem:[%s791_s3 + $0x40] sm:$0xff] }
   0x8   :  { %482 = vmatpush3.bf16.msra.mxu0 %v481_v7  ;;  %504 = vmatprep.subr.bf16.mxu1 %v556_v0  ;;  %v42_v30 = vld [vmem:[%s789_s1 + $0x58] sm:$0xff]  ;;  %v511_v31 = vpack.c.bf16 %v132_v27, %v131_v26  ;;  %v134_v33 = vld [vmem:[%s791_s3 + $0x48] sm:$0xff]  ;;  %v43_v35 = vld [vmem:[%s789_s1 + $0x60] sm:$0xff] }
   0x9   :  { %483 = vmatprep.subr.bf16.mxu0 %v556_v0  ;;  %v493_v34 = vpack.c.bf16 %v42_v30, %v41_v29  ;;  %v44_v36 = vld [vmem:[%s789_s1 + $0x68] sm:$0xff]  ;;  %v514_v37 = vpack.c.bf16 %v134_v33, %v133_v32  ;;  %v45_v39 = vld [vmem:[%s789_s1 + $0x70] sm:$0xff]  ;;  %v46_v40 = vld [vmem:[%s789_s1 + $0x78] sm:$0xff] }
   0xa   :  { %v496_v38 = vpack.c.bf16 %v44_v36, %v43_v35  ;;  %v499_v41 = vpack.c.bf16 %v46_v40, %v45_v39  ;;  %v135_v43 = vld [vmem:[%s791_s3 + $0x50] sm:$0xff]  ;;  %v136_v44 = vld [vmem:[%s791_s3 + $0x58] sm:$0xff]  ;;  %v137_v46 = vld [vmem:[%s791_s3 + $0x60] sm:$0xff] }
   0xb   :  { %506 = vmatpush3.bf16.msra.mxu1 %v505_v19  ;;  %v30_v42 = vld [vmem:[#allocation2] sm:$0xff]  ;;  %v517_v45 = vpack.c.bf16 %v136_v44, %v135_v43  ;;  %v138_v47 = vld [vmem:[%s791_s3 + $0x68] sm:$0xff]  ;;  %v139_v49 = vld [vmem:[%s791_s3 + $0x70] sm:$0xff] }
   0xc   :  { %485 = vmatpush3.bf16.msra.mxu0 %v484_v15  ;;  %507 = vmatprep.subr.bf16.mxu1 %v556_v0  ;;  %v520_v48 = vpack.c.bf16 %v138_v47, %v137_v46  ;;  %v140_v50 = vld [vmem:[%s791_s3 + $0x78] sm:$0xff]  ;;  %v219_v52 = vld [vmem:[%s792_s5] sm:$0xff]  ;;  %v220_v53 = vld [vmem:[%s792_s5 + $0x8] sm:$0xff] }
   0xd   :  { %486 = vmatprep.subr.bf16.mxu0 %v556_v0  ;;  %v523_v51 = vpack.c.bf16 %v140_v50, %v139_v49  ;;  %v221_v54 = vld [vmem:[%s792_s5 + $0x10] sm:$0xff]  ;;  %v526_v55 = vpack.c.bf16 %v220_v53, %v219_v52  ;;  %v222_v56 = vld [vmem:[%s792_s5 + $0x18] sm:$0xff]  ;;  %v223_v58 = vld [vmem:[%s792_s5 + $0x20] sm:$0xff] }
   0xe   :  { %v529_v57 = vpack.c.bf16 %v222_v56, %v221_v54  ;;  %v224_v59 = vld [vmem:[%s792_s5 + $0x28] sm:$0xff]  ;;  %v225_v61 = vld [vmem:[%s792_s5 + $0x30] sm:$0xff]  ;;  %v226_v62 = vld [vmem:[%s792_s5 + $0x38] sm:$0xff] }
   0xf   :  { %509 = vmatpush3.bf16.msra.mxu1 %v508_v25  ;;  %v532_v60 = vpack.c.bf16 %v224_v59, %v223_v58  ;;  %v535_v63 = vpack.c.bf16 %v226_v62, %v225_v61  ;;  %v227_v1 = vld [vmem:[%s792_s5 + $0x40] sm:$0xff]  ;;  %v228_v2 = vld [vmem:[%s792_s5 + $0x48] sm:$0xff]  ;;  %v229_v9 = vld [vmem:[%s792_s5 + $0x50] sm:$0xff] }
  0x10   :  { %488 = vmatpush3.bf16.msra.mxu0 %v487_v22  ;;  %510 = vmatprep.subr.bf16.mxu1 %v556_v0  ;;  %v538_v3 = vpack.c.bf16 %v228_v2, %v227_v1  ;;  %v230_v10 = vld [vmem:[%s792_s5 + $0x58] sm:$0xff]  ;;  %v231_v12 = vld [vmem:[%s792_s5 + $0x60] sm:$0xff]  ;;  %v232_v13 = vld [vmem:[%s792_s5 + $0x68] sm:$0xff] }
  0x11   :  { %489 = vmatprep.subr.bf16.mxu0 %v556_v0  ;;  %v541_v11 = vpack.c.bf16 %v230_v10, %v229_v9  ;;  %v544_v14 = vpack.c.bf16 %v232_v13, %v231_v12  ;;  %v233_v15 = vld [vmem:[%s792_s5 + $0x70] sm:$0xff]  ;;  %v234_v16 = vld [vmem:[%s792_s5 + $0x78] sm:$0xff]  ;;  %v319_v18 = vld [vmem:[%s794_s4] ss:$0 sm:$0xff] }
  0x12   :  { %v547_v17 = vpack.c.bf16 %v234_v16, %v233_v15  ;;  %v320_v23 = vld [vmem:[%s795_s6] ss:$0 sm:$0xff] }
  0x13   :  { %512 = vmatpush3.bf16.msra.mxu1 %v511_v31 }
  0x14   :  { %491 = vmatpush3.bf16.msra.mxu0 %v490_v28  ;;  %513 = vmatprep.subr.bf16.mxu1 %v556_v0 }
  0x15   :  { %492 = vmatprep.subr.bf16.mxu0 %v556_v0 }
  0x17   :  { %515 = vmatpush3.bf16.msra.mxu1 %v514_v37 }
  0x18   :  { %494 = vmatpush3.bf16.msra.mxu0 %v493_v34  ;;  %516 = vmatprep.subr.bf16.mxu1 %v556_v0 }
  0x19   :  { %495 = vmatprep.subr.bf16.mxu0 %v556_v0 }
  0x1b   :  { %518 = vmatpush3.bf16.msra.mxu1 %v517_v45 }
  0x1c   :  { %497 = vmatpush3.bf16.msra.mxu0 %v496_v38  ;;  %519 = vmatprep.subr.bf16.mxu1 %v556_v0 }
  0x1d   :  { %498 = vmatprep.subr.bf16.mxu0 %v556_v0 }
  0x1f   :  { %521 = vmatpush3.bf16.msra.mxu1 %v520_v48 }
  0x20   :  { %500 = vmatpush3.bf16.msra.mxu0 %v499_v41  ;;  %522 = vmatprep.subr.bf16.mxu1 %v556_v0 }
  0x21   :  { %525 = vmatprep.subr.bf16.mxu0 %v556_v0 }
  0x23   :  { %405 = vmatmul.mubr.f32.vlgmr.msra.gmra.mrb[0].mxu0 %v30_v42  ;;  %524 = vmatpush3.bf16.msra.mxu1 %v523_v51 }
  0x24   :  { %474 = vmatprep.mubr.msk.f32.mxu0 %vm558_vm0, %v557_v4  ;;  %527 = vmatpush3.bf16.msra.mxu0 %v526_v55  ;;  %v318_v4 = vld [vmem:[%s793_s2] ss:$0 sm:$0xff] }
  0x25   :  { %528 = vmatprep.subr.bf16.mxu0 %v556_v0 }
  0x28   :  { %530 = vmatpush3.bf16.msra.mxu0 %v529_v57 }
  0x29   :  { %531 = vmatprep.subr.bf16.mxu0 %v556_v0 }
  0x2c   :  { %533 = vmatpush3.bf16.msra.mxu0 %v532_v60 }
  0x2d   :  { %534 = vmatprep.subr.bf16.mxu0 %v556_v0 }
  0x30   :  { %536 = vmatpush3.bf16.msra.mxu0 %v535_v63 }
  0x31   :  { %537 = vmatprep.subr.bf16.mxu0 %v556_v0 }
  0x34   :  { %539 = vmatpush3.bf16.msra.mxu0 %v538_v3 }
  0x35   :  { %540 = vmatprep.subr.bf16.mxu0 %v556_v0 }
  0x38   :  { %542 = vmatpush3.bf16.msra.mxu0 %v541_v11 }
  0x39   :  { %543 = vmatprep.subr.bf16.mxu0 %v556_v0 }
  0x3c   :  { %545 = vmatpush3.bf16.msra.mxu0 %v544_v14 }
  0x3d   :  { %546 = vmatprep.subr.bf16.mxu0 %v556_v0 }
  0x40   :  { %548 = vmatpush3.bf16.msra.mxu0 %v547_v17 }
  0xf6   :  { %v120_v5 = vpop.f32.mrb[0].mxu0 }
  0xf7   :  { %v121_v6 = vadd.f32 %v318_v4, %v120_v5  ;;  %v406_v7 = vpop.f32.mrb[1].mxu0 }
  0xf9   :  { %552 = vtanh.f32 %v121_v6 }
 0x103   :  { %v553_v8 = vpop.eup %552 }
 0x104   :  { %440 = vmatmul.mubr.f32.vlgmr.msra.gmra.mrb[0].mxu1 %v553_v8 }
 0x1d7   :  { %v214_v19 = vpop.f32.mrb[0].mxu1 }
 0x1d8   :  { %v215_v20 = vadd.f32 %v319_v18, %v214_v19  ;;  %v441_v21 = vpop.f32.mrb[1].mxu1 }
 0x1da   :  { %554 = vtanh.f32 %v215_v20 }
 0x1e4   :  { %v555_v22 = vpop.eup %554 }
 0x1e5   :  { %475 = vmatmul.mubr.f32.vlgmr.msra.gmra.mrb[2].mxu0 %v555_v22 }
 0x2b8   :  { %v308_v24 = vpop.f32.mrb[2].mxu0 }
 0x2b9   :  { %v309_v25 = vadd.f32 %v320_v23, %v308_v24  ;;  %v476_v26 = vpop.f32.mrb[3].mxu0 }
 0x2bb   :  { %313 = vst.msk [vmem:[%s796_s7] sm:$0xff] %vm312_vm2, %v309_v25 }

</bundles_post_ra>
